<compile_context>
chip_gen: v5e
topology: v5e:2x2
jax: 0.10.0
libtpu: 0.0.40
codegen_flags: <defaults>
</compile_context>

<pallas_src>
import jax
import jax.numpy as jnp
from jax.experimental import pallas as pl
from jax.experimental.pallas import tpu as pltpu


def pa_kernel(x_ref, w1_ref, b1_ref, w2_ref, b2_ref, o_ref):
    """One grid step over kB images (or one image slice), spatial on lanes.

    x_ref:  (kB, C, T)  input block (input dtype)
    w1_ref: (Cr, C)     conv1 1x1 weight, pre-cast to x.dtype (native MXU path)
    b1_ref: (Cr, 1)     conv1 bias (f32)
    w2_ref: (Cr, 1)     conv2 1x1 weight as a column (f32)
    b2_ref: (1, 1)      conv2 bias, SMEM scalar (f32)
    o_ref:  (kB, C, T)  output block
    """
    kB = x_ref.shape[0]
    w1 = w1_ref[...]
    b1 = b1_ref[...]
    w2 = w2_ref[...]
    b2 = b2_ref[0, 0]

    def body(b, carry):
        xb = x_ref[b]                                        # (C, T), input dtype
        # conv1x1 #1 (C -> C//8) on the MXU, f32 accumulation, + bias, ReLU.
        h = jnp.dot(w1, xb, preferred_element_type=jnp.float32) + b1
        h = jnp.maximum(h, 0.0)                              # (Cr, T) f32
        # conv1x1 #2 (C//8 -> 1): degenerate matmul as VPU mul + sublane sum.
        g = jnp.sum(h * w2, axis=0, keepdims=True) + b2      # (1, T) f32
        y = jax.nn.sigmoid(g)
        # Pixel attention: broadcast the single-channel gate over C channels.
        o_ref[b] = xb * y.astype(xb.dtype)
        return carry

    jax.lax.fori_loop(0, kB, body, 0, unroll=(kB <= 8))


def _choose_tiling(N, C, HW, dtype_bytes,
                   target_block_bytes=2 << 20, max_block_bytes=6 << 20):
    """Pick (kB images per block, spatial tile) for a (kB, C, tile) block.

    Prefers tile == HW (one contiguous DMA per image) and packs images until the
    block reaches ~target_block_bytes, capped at max_block_bytes so that
    double-buffered in+out (4x block) stays under every generation's scoped
    VMEM budget (v7x: 32 MiB scoped / 64 MiB physical).
    """
    img_bytes = C * HW * dtype_bytes
    if img_bytes <= max_block_bytes:
        tile = HW                                    # whole image: contiguous DMA
        divs = [d for d in range(1, N + 1) if N % d == 0]
        kB = 1
        for d in divs:                               # ascending divisors of N
            if d * img_bytes > max_block_bytes:
                break
            kB = d
            if d * img_bytes >= target_block_bytes:
                break
        # Keep the batch grid axis >= 2 for v7x's two TensorCores when the
        # smaller block still meets the byte target.
        if kB == N and N > 1 and N % 2 == 0 and (N // 2) * img_bytes >= target_block_bytes:
            kB = N // 2
    else:
        assert HW % 128 == 0, (
            "H*W must be a multiple of 128 when a single image exceeds the "
            "VMEM block budget")
        # TODO(synk): ragged H*W (not a multiple of 128) would need a padded /
        # masked tail tile before production use.
        kB = 1
        tile = min((max_block_bytes // (C * dtype_bytes)) // 128 * 128,
                   (HW // 128) * 128)
        tile = max(tile, 128)
        while tile > 128 and HW % tile != 0:
            tile -= 128
    return kB, tile


def pa_layer(x_nchw, w1, b1, w2, b2, *,
             target_block_bytes=2 << 20, max_block_bytes=6 << 20):
    """x_nchw: (N, C, H, W). w1: (Cr, C) [torch 1x1 conv weight squeezed],
    b1: (Cr,), w2: (1, Cr), b2: (1,)."""
    N, C, H, W = x_nchw.shape
    Cr = w1.shape[0]
    HW = H * W
    assert C >= 8 and Cr == C // 8, "PALayer needs channel//8 >= 1"

    dtype_bytes = jnp.dtype(x_nchw.dtype).itemsize
    kB, tile = _choose_tiling(N, C, HW, dtype_bytes,
                              target_block_bytes=target_block_bytes,
                              max_block_bytes=max_block_bytes)

    # Pure reshape (contiguous dims) -> no transpose, no extra HBM traffic.
    x3d = x_nchw.reshape(N, C, HW)

    # Weights: w1 in the input dtype (native MXU path, no per-block upcast of x);
    # the tiny gate math (biases, w2) stays f32.
    w1_m = w1.reshape(Cr, C).astype(x_nchw.dtype)
    b1_m = b1.reshape(Cr, 1).astype(jnp.float32)
    w2_m = w2.reshape(Cr, 1).astype(jnp.float32)   # (1, Cr) -> column, same order
    b2_m = b2.reshape(1, 1).astype(jnp.float32)

    grid = (N // kB, HW // tile)
    out3d = pl.pallas_call(
        pa_kernel,
        out_shape=jax.ShapeDtypeStruct((N, C, HW), x3d.dtype),
        grid=grid,
        in_specs=[
            # x block: images [n*kB, (n+1)*kB), all C channels, spatial tile j.
            pl.BlockSpec((kB, C, tile), lambda n, j: (n, 0, j)),
            pl.BlockSpec((Cr, C), lambda n, j: (0, 0)),          # w1 (resident)
            pl.BlockSpec((Cr, 1), lambda n, j: (0, 0)),          # b1
            pl.BlockSpec((Cr, 1), lambda n, j: (0, 0)),          # w2 (column)
            pl.BlockSpec(memory_space=pltpu.MemorySpace.SMEM),   # b2 scalar
        ],
        out_specs=pl.BlockSpec((kB, C, tile), lambda n, j: (n, 0, j)),
        compiler_params=pltpu.CompilerParams(
            dimension_semantics=("parallel", "parallel"),
            # Raise v5e's 16 MiB scoped default; safe on v6e/v7x as well.
            vmem_limit_bytes=32 << 20,
        ),
    )(x3d, w1_m, b1_m, w2_m, b2_m)

    return out3d.reshape(N, C, H, W)


def pa_layer_ref(x, w1, b1, w2, b2):
    """Pure-JAX reference matching the PyTorch forward (NCHW, 1x1 convs)."""
    h = jnp.einsum("nchw,oc->nohw", x, w1) + b1[None, :, None, None]
    h = jnp.maximum(h, 0.0)
    y = jnp.einsum("nchw,oc->nohw", h, w2) + b2[None, :, None, None]
    y = jax.nn.sigmoid(y)
    return x * y


if __name__ == "__main__":
    key = jax.random.PRNGKey(0)
    N, C, H, W = 2, 16, 16, 16        # channel must be >= 8 (C // 8 hidden dim)
    Cr = C // 8

    k_x, k_w1, k_b1, k_w2, k_b2 = jax.random.split(key, 5)
    x = jax.random.normal(k_x, (N, C, H, W), dtype=jnp.float32)
    # Synthetic parameters (shapes follow nn.Conv2d(C, C//8, 1) / (C//8, 1, 1)).
    w1 = 0.1 * jax.random.normal(k_w1, (Cr, C), dtype=jnp.float32)
    b1 = 0.1 * jax.random.normal(k_b1, (Cr,), dtype=jnp.float32)
    w2 = 0.1 * jax.random.normal(k_w2, (1, Cr), dtype=jnp.float32)
    b2 = 0.1 * jax.random.normal(k_b2, (1,), dtype=jnp.float32)

    out = jax.block_until_ready(pa_layer(x, w1, b1, w2, b2))
    ref = pa_layer_ref(x, w1, b1, w2, b2)
    assert out.shape == (N, C, H, W)
    assert jnp.allclose(out, ref, atol=1e-5, rtol=1e-5), "mismatch vs reference"

    # Second small shape exercises the multi-image packed path (kB > 1).
    N2, H2, W2 = 4, 8, 16
    x2 = jax.random.normal(k_x, (N2, C, H2, W2), dtype=jnp.float32)
    out2 = jax.block_until_ready(pa_layer(x2, w1, b1, w2, b2))
    ref2 = pa_layer_ref(x2, w1, b1, w2, b2)
    assert jnp.allclose(out2, ref2, atol=1e-5, rtol=1e-5), "mismatch vs reference (packed)"

    print("KERNEL_OK")
</pallas_src>

<mosaic_0001>
module attributes {stable_mosaic.version = 11 : i64} {
  func.func @pa_kernel(%arg0: i32, %arg1: i32, %arg2: memref<2x16x256xf32, #tpu.memory_space<vmem>>, %arg3: memref<2x16xf32, #tpu.memory_space<vmem>>, %arg4: memref<2x1xf32, #tpu.memory_space<vmem>>, %arg5: memref<2x1xf32, #tpu.memory_space<vmem>>, %arg6: memref<1x1xf32, #tpu.memory_space<smem>>, %arg7: memref<2x16x256xf32, #tpu.memory_space<vmem>>) attributes {dimension_semantics = [#tpu.dimension_semantics<parallel>, #tpu.dimension_semantics<parallel>], iteration_bounds = array<i64: 1, 1>, scalar_prefetch = 0 : i64, scratch_operands = 0 : i64, tpu.core_type = #tpu.core_type<tc>, window_params = [{transform_indices = @transform_0, window_bounds = array<i64: 2, 16, 256>}, {pipeline_mode = #tpu.pipeline_mode<synchronous>, transform_indices = @transform_1, window_bounds = array<i64: 2, 16>}, {pipeline_mode = #tpu.pipeline_mode<synchronous>, transform_indices = @transform_2, window_bounds = array<i64: 2, 1>}, {pipeline_mode = #tpu.pipeline_mode<synchronous>, transform_indices = @transform_3, window_bounds = array<i64: 2, 1>}, {transform_indices = @transform_4, window_bounds = array<i64: 1, 1>}, {transform_indices = @transform_5, window_bounds = array<i64: 2, 16, 256>}]} {
    %c0 = arith.constant 0 : index
    %c0_0 = arith.constant 0 : index
    %0 = vector.load %arg3[%c0, %c0_0] : memref<2x16xf32, #tpu.memory_space<vmem>>, vector<2x16xf32>
    %c0_1 = arith.constant 0 : index
    %c0_2 = arith.constant 0 : index
    %1 = vector.load %arg4[%c0_1, %c0_2] : memref<2x1xf32, #tpu.memory_space<vmem>>, vector<2x1xf32>
    %c0_3 = arith.constant 0 : index
    %c0_4 = arith.constant 0 : index
    %2 = vector.load %arg5[%c0_3, %c0_4] : memref<2x1xf32, #tpu.memory_space<vmem>>, vector<2x1xf32>
    %c0_5 = arith.constant 0 : index
    %c0_6 = arith.constant 0 : index
    %3 = memref.load %arg6[%c0_5, %c0_6] : memref<1x1xf32, #tpu.memory_space<smem>>
    %c0_i32 = arith.constant 0 : i32
    %4 = arith.index_cast %c0_i32 : i32 to index
    %c0_7 = arith.constant 0 : index
    %c0_8 = arith.constant 0 : index
    %5 = vector.load %arg2[%4, %c0_7, %c0_8] : memref<2x16x256xf32, #tpu.memory_space<vmem>>, vector<1x16x256xf32>
    %6 = vector.shape_cast %5 : vector<1x16x256xf32> to vector<16x256xf32>
    %cst = arith.constant dense<0.000000e+00> : vector<2x256xf32>
    %7 = tpu.matmul %0, %6, %cst {dimension_numbers = #tpu.dot_dimension_numbers<[1], [0], [0], [1], [0, 0, 1, 1], [], []>} : vector<2x16xf32>, vector<16x256xf32>, vector<2x256xf32> -> vector<2x256xf32>
    %8 = vector.broadcast %1 : vector<2x1xf32> to vector<2x256xf32>
    %9 = arith.addf %7, %8 : vector<2x256xf32>
    %cst_9 = arith.constant 0.000000e+00 : f32
    %10 = vector.broadcast %cst_9 : f32 to vector<2x256xf32>
    %11 = arith.maximumf %9, %10 : vector<2x256xf32>
    %12 = vector.broadcast %2 : vector<2x1xf32> to vector<2x256xf32>
    %13 = arith.mulf %11, %12 : vector<2x256xf32>
    %cst_10 = arith.constant dense<0.000000e+00> : vector<256xf32>
    %14 = vector.multi_reduction <add>, %13, %cst_10 [0] : vector<2x256xf32> to vector<256xf32>
    %15 = vector.shape_cast %14 : vector<256xf32> to vector<1x256xf32>
    %16 = vector.broadcast %3 : f32 to vector<1x256xf32>
    %17 = arith.addf %15, %16 : vector<1x256xf32>
    %18 = arith.negf %17 : vector<1x256xf32>
    %19 = math.exp %18 : vector<1x256xf32>
    %cst_11 = arith.constant 1.000000e+00 : f32
    %20 = vector.broadcast %cst_11 : f32 to vector<1x256xf32>
    %21 = arith.addf %20, %19 : vector<1x256xf32>
    %22 = arith.divf %20, %21 : vector<1x256xf32>
    %23 = vector.broadcast %22 : vector<1x256xf32> to vector<16x256xf32>
    %24 = arith.mulf %6, %23 : vector<16x256xf32>
    %25 = arith.index_cast %c0_i32 : i32 to index
    %c0_12 = arith.constant 0 : index
    %c0_13 = arith.constant 0 : index
    %26 = vector.load %arg7[%25, %c0_12, %c0_13] : memref<2x16x256xf32, #tpu.memory_space<vmem>>, vector<1x16x256xf32>
    %27 = vector.shape_cast %26 : vector<1x16x256xf32> to vector<16x256xf32>
    %28 = vector.shape_cast %24 : vector<16x256xf32> to vector<1x16x256xf32>
    tpu.vector_store %arg7[%25, %c0_12, %c0_13], %28 {strides = array<i32>} : memref<2x16x256xf32, #tpu.memory_space<vmem>>, vector<1x16x256xf32>,
    %c1_i32 = arith.constant 1 : i32
    %29 = arith.index_cast %c1_i32 : i32 to index
    %c0_14 = arith.constant 0 : index
    %c0_15 = arith.constant 0 : index
    %30 = vector.load %arg2[%29, %c0_14, %c0_15] : memref<2x16x256xf32, #tpu.memory_space<vmem>>, vector<1x16x256xf32>
    %31 = vector.shape_cast %30 : vector<1x16x256xf32> to vector<16x256xf32>
    %cst_16 = arith.constant dense<0.000000e+00> : vector<2x256xf32>
    %32 = tpu.matmul %0, %31, %cst_16 {dimension_numbers = #tpu.dot_dimension_numbers<[1], [0], [0], [1], [0, 0, 1, 1], [], []>} : vector<2x16xf32>, vector<16x256xf32>, vector<2x256xf32> -> vector<2x256xf32>
    %33 = vector.broadcast %1 : vector<2x1xf32> to vector<2x256xf32>
    %34 = arith.addf %32, %33 : vector<2x256xf32>
    %cst_17 = arith.constant 0.000000e+00 : f32
    %35 = vector.broadcast %cst_17 : f32 to vector<2x256xf32>
    %36 = arith.maximumf %34, %35 : vector<2x256xf32>
    %37 = vector.broadcast %2 : vector<2x1xf32> to vector<2x256xf32>
    %38 = arith.mulf %36, %37 : vector<2x256xf32>
    %cst_18 = arith.constant dense<0.000000e+00> : vector<256xf32>
    %39 = vector.multi_reduction <add>, %38, %cst_18 [0] : vector<2x256xf32> to vector<256xf32>
    %40 = vector.shape_cast %39 : vector<256xf32> to vector<1x256xf32>
    %41 = vector.broadcast %3 : f32 to vector<1x256xf32>
    %42 = arith.addf %40, %41 : vector<1x256xf32>
    %43 = arith.negf %42 : vector<1x256xf32>
    %44 = math.exp %43 : vector<1x256xf32>
    %cst_19 = arith.constant 1.000000e+00 : f32
    %45 = vector.broadcast %cst_19 : f32 to vector<1x256xf32>
    %46 = arith.addf %45, %44 : vector<1x256xf32>
    %47 = arith.divf %45, %46 : vector<1x256xf32>
    %48 = vector.broadcast %47 : vector<1x256xf32> to vector<16x256xf32>
    %49 = arith.mulf %31, %48 : vector<16x256xf32>
    %50 = arith.index_cast %c1_i32 : i32 to index
    %c0_20 = arith.constant 0 : index
    %c0_21 = arith.constant 0 : index
    %51 = vector.load %arg7[%50, %c0_20, %c0_21] : memref<2x16x256xf32, #tpu.memory_space<vmem>>, vector<1x16x256xf32>
    %52 = vector.shape_cast %51 : vector<1x16x256xf32> to vector<16x256xf32>
    %53 = vector.shape_cast %49 : vector<16x256xf32> to vector<1x16x256xf32>
    tpu.vector_store %arg7[%50, %c0_20, %c0_21], %53 {strides = array<i32>} : memref<2x16x256xf32, #tpu.memory_space<vmem>>, vector<1x16x256xf32>,
    %c2_i32 = arith.constant 2 : i32
    return
  }
  func.func @transform_0(%arg0: i32, %arg1: i32) -> (i32, i32, i32) {
    %c0_i32 = arith.constant 0 : i32
    %c0_i32_0 = arith.constant 0 : i32
    return %arg0, %c0_i32, %arg1 : i32, i32, i32
  }
  func.func @transform_1(%arg0: i32, %arg1: i32) -> (i32, i32) {
    %c0_i32 = arith.constant 0 : i32
    %c0_i32_0 = arith.constant 0 : i32
    %c0_i32_1 = arith.constant 0 : i32
    return %c0_i32, %c0_i32_0 : i32, i32
  }
  func.func @transform_2(%arg0: i32, %arg1: i32) -> (i32, i32) {
    %c0_i32 = arith.constant 0 : i32
    %c0_i32_0 = arith.constant 0 : i32
    %c0_i32_1 = arith.constant 0 : i32
    return %c0_i32, %c0_i32_0 : i32, i32
  }
  func.func @transform_3(%arg0: i32, %arg1: i32) -> (i32, i32) {
    %c0_i32 = arith.constant 0 : i32
    %c0_i32_0 = arith.constant 0 : i32
    %c0_i32_1 = arith.constant 0 : i32
    return %c0_i32, %c0_i32_0 : i32, i32
  }
  func.func @transform_4(%arg0: i32, %arg1: i32) -> (i32, i32) {
    %c0_i32 = arith.constant 0 : i32
    %c0_i32_0 = arith.constant 0 : i32
    %c0_i32_1 = arith.constant 0 : i32
    return %c0_i32, %c0_i32_0 : i32, i32
  }
  func.func @transform_5(%arg0: i32, %arg1: i32) -> (i32, i32, i32) {
    %c0_i32 = arith.constant 0 : i32
    %c0_i32_0 = arith.constant 0 : i32
    return %arg0, %c0_i32, %arg1 : i32, i32, i32
  }
}

</mosaic_0001>

<bundles_post_ra>
// kernel: tpu_custom_call.1
= control target key start
LH: loop header
LB: loop body
LE: loop exit
PB: predicated region body
PF: predicated region fallthrough
CT: control target
= control target key end

     0   :  { %11 = vsyncpa [#allocation4], 0  ;;  %s483_s0 = inlined_call_operand.hbm [shape: f32[2,16,256], index: 0, kind: input, shape index: {}]   ;;  %s484_s1 = inlined_call_operand.vmem [shape: f32[2,16], index: 1, kind: input, shape index: {}]   ;;  %s485_s2 = inlined_call_operand.vmem [shape: f32[2,1], index: 2, kind: input, shape index: {}]   ;;  %s486_s3 = inlined_call_operand.vmem [shape: f32[2,1], index: 3, kind: input, shape index: {}]   ;;  %s487_s4 = inlined_call_operand.<no memory space> [shape: f32[1,1], index: 4, kind: input, shape index: {}]   ;;  %s488_s5 = inlined_call_operand.hbm [shape: f32[2,16,256], index: 5, kind: output, shape index: {}]  }
   0x1   :  { %12 = vsyncpa [#allocation5], 0  ;;  %s17_s20 = sshll.u32 %s483_s0, 4  ;;  %s381_s21 = smov [#allocation3]   ;;  %s18_s20 = int_to_ptr.hbm [resolvable:$true] %s17_s20 }
   0x2   :  { %s19_s22 = sshll.u32 %s381_s21, 4  ;;  %s382_s23 = smov 256   ;;  %s20_s22 = int_to_ptr.vmem [resolvable:$true] %s19_s22 }
   0x3   :  { %s383_s24 = smov 16  }
   0x4   :  { %25 = dma.hbm_to_vmem [thread:$0]  %s18_s20, 1024, %s20_s22, [#allocation4], %s382_s23, %s382_s23, %s383_s24  }
   0x5   :  { %377 = dma.done.wait [#allocation4], 1024  }
   0x6   :  { %378 = vsyncadd [#allocation4], 4294966272  ;;  %v384_v0 = vmov 0   ;;  %v422_v1 = vld [vmem:[#allocation3 + $0x10] sm:$0xff]  ;;  %v424_v2 = vld [vmem:[#allocation3 + $0x18] sm:$0xff]  ;;  %vm51_vm0 = vcmask 130048   ;;  %v119_v46 = vstv %s487_s4 }
   0x7   :  { %312 = vset.pattern.permute.xlu0 %v384_v0  ;;  %v426_v3 = vld [vmem:[#allocation3 + $0x30] sm:$0xff]  ;;  %69 = vmatpush.msra.mxu0 %v422_v1  ;;  %v430_v4 = vld [vmem:[#allocation3 + $0x38] sm:$0xff]  ;;  %v432_v5 = vld [vmem:[#allocation3] sm:$0xff]  ;;  %vm104_vm1 = vcmask 1041408   ;;  %s385_s4 = smov [#allocation6]   ;;  %s286_s7 = sshll.u32 %s488_s5, 4  ;;  %s287_s7 = int_to_ptr.hbm [resolvable:$true] %s286_s7 }
   0x8   :  { %89 = vmatpush.msra.mxu1 %v424_v2  ;;  %v434_v6 = vld [vmem:[#allocation3 + $0x8] sm:$0xff]  ;;  %187 = vmatpush.msra.mxu2 %v426_v3  ;;  %v438_v7 = vld [vmem:[#allocation3 + $0x20] sm:$0xff]  ;;  %s284_s29 = sshll.u32 %s385_s4, 4  ;;  %s285_s29 = int_to_ptr.vmem [resolvable:$true] %s284_s29 }
   0x9   :  { %207 = vmatpush.msra.mxu3 %v430_v4  ;;  %v440_v8 = vld [vmem:[#allocation3 + $0x28] sm:$0xff]  ;;  %v38_v9 = vld [vmem:[%s484_s1] sm:$0x3]  ;;  %70 = vmatpush.msra.mxu0 %v432_v5 }
   0xa   :  { %90 = vmatpush.msra.mxu1 %v434_v6  ;;  %188 = vmatpush.msra.mxu2 %v438_v7  ;;  %v39_v10 = vld [vmem:[%s485_s2] sm:$0x3] }
   0xb   :  { %208 = vmatpush.msra.mxu3 %v440_v8  ;;  %299 = vmatmul.msk.f32.vlgmr.msra.gmra.mxu0 %vm51_vm0, %v38_v9  ;;  %v40_v11 = vld [vmem:[%s486_s3] sm:$0x3] }
   0xc   :  { %300 = vmatmul.msk.f32.vlgmr.msra.gmra.mxu1 %vm51_vm0, %v38_v9  ;;  %303 = vmatmul.msk.f32.vlgmr.msra.gmra.mxu2 %vm51_vm0, %v38_v9 }
   0xd   :  { %304 = vmatmul.msk.f32.vlgmr.msra.gmra.mxu3 %vm51_vm0, %v38_v9  ;;  %48 = vperm.xlu0 %312, %v39_v10  }
  0x15   :  { %99 = vperm.xlu0 %312, %v40_v11  }
  0x7f   :  { %v49_v12 = vpop.permute.xlu0 %48 }
  0x87   :  { %v100_v19 = vpop.permute.xlu0 %99 }
  0x88   :  { %v72_v13 = vpop.f32.mrf.mxu0 }
  0x89   :  { %v92_v14 = vpop.f32.mrf.mxu1  ;;  %v73_v15 = vadd.f32 %v72_v13, %v49_v12 }
  0x8a   :  { %v93_v16 = vadd.f32 %v92_v14, %v49_v12 }
  0x8b   :  { %v95_v17 = vmax.f32 %v73_v15, 0.0 }
  0x8c   :  { %v96_v18 = vmax.f32 %v93_v16, 0.0 }
  0x8d   :  { %v102_v20 = vmul.f32 %v100_v19, %v95_v17 }
  0x8e   :  { %v103_v21 = vmul.f32 %v100_v19, %v96_v18 }
  0x8f   :  { %v105_v22 = vsel %vm104_vm1, %v102_v20, 0.0  ;;  %v190_v24 = vpop.f32.mrf.mxu2 }
  0x90   :  { %v112_v23 = vsel %vm104_vm1, %v103_v21, 0.0  ;;  %v210_v25 = vpop.f32.mrf.mxu3  ;;  %v106_v26 = vrot.slane %v105_v22, 4  ;;  %v191_v28 = vadd.f32 %v190_v24, %v49_v12 }
  0x91   :  { %v113_v27 = vrot.slane %v112_v23, 4  ;;  %v211_v29 = vadd.f32 %v210_v25, %v49_v12 }
  0x92   :  { %v107_v30 = vadd.f32 %v106_v26, %v105_v22  ;;  %v213_v32 = vmax.f32 %v191_v28, 0.0 }
  0x93   :  { %v114_v31 = vadd.f32 %v113_v27, %v112_v23  ;;  %v214_v33 = vmax.f32 %v211_v29, 0.0 }
  0x94   :  { %v108_v34 = vrot.slane %v107_v30, 2  ;;  %v215_v36 = vmul.f32 %v213_v32, %v100_v19 }
  0x95   :  { %v115_v35 = vrot.slane %v114_v31, 2  ;;  %v216_v37 = vmul.f32 %v214_v33, %v100_v19 }
  0x96   :  { %v109_v38 = vadd.f32 %v108_v34, %v107_v30  ;;  %v217_v40 = vsel %vm104_vm1, %v215_v36, 0.0 }
  0x97   :  { %v116_v39 = vadd.f32 %v115_v35, %v114_v31  ;;  %v224_v41 = vsel %vm104_vm1, %v216_v37, 0.0  ;;  %v218_v42 = vrot.slane %v217_v40, 4 }
  0x98   :  { %v225_v43 = vrot.slane %v224_v41, 4  ;;  %v110_v44 = vrot.slane %v109_v38, 1 }
  0x99   :  { %v117_v45 = vrot.slane %v116_v39, 1  ;;  %v219_v47 = vadd.f32 %v218_v42, %v217_v40 }
  0x9a   :  { %v226_v48 = vadd.f32 %v225_v43, %v224_v41  ;;  %v111_v49 = vadd.f32 %v110_v44, %v109_v38 }
  0x9b   :  { %v118_v50 = vadd.f32 %v117_v45, %v116_v39  ;;  %v220_v51 = vrot.slane %v219_v47, 2 }
  0x9c   :  { %v227_v52 = vrot.slane %v226_v48, 2  ;;  %v120_v53 = vadd.f32 %v119_v46, %v111_v49 }
  0x9d   :  { %v121_v54 = vadd.f32 %v119_v46, %v118_v50  ;;  %v221_v55 = vadd.f32 %v220_v51, %v219_v47 }
  0x9e   :  { %v228_v56 = vadd.f32 %v227_v52, %v226_v48  ;;  %v301_v57 = vmul.f32 -1.442695, %v120_v53 }
  0x9f   :  { %v302_v58 = vmul.f32 -1.442695, %v121_v54  ;;  %v222_v59 = vrot.slane %v221_v55, 1 }
  0xa0   :  { %v229_v60 = vrot.slane %v228_v56, 1  ;;  %313 = vpow2.f32 %v301_v57 }
  0xa1   :  { %315 = vpow2.f32 %v302_v58  ;;  %v223_v61 = vadd.f32 %v222_v59, %v221_v55 }
  0xa2   :  { %v230_v62 = vadd.f32 %v229_v60, %v228_v56 }
  0xa3   :  { %v231_v63 = vadd.f32 %v223_v61, %v119_v46 }
  0xa4   :  { %v232_v0 = vadd.f32 %v230_v62, %v119_v46 }
  0xa5   :  { %v305_v9 = vmul.f32 -1.442695, %v231_v63 }
  0xa6   :  { %v306_v10 = vmul.f32 -1.442695, %v232_v0  ;;  %v314_v11 = vpop.eup %313 }
  0xa7   :  { %v316_v12 = vpop.eup %315  ;;  %v128_v13 = vadd.f32 1.0, %v314_v11  ;;  %317 = vpow2.f32 %v305_v9 }
  0xa8   :  { %v129_v14 = vadd.f32 1.0, %v316_v12  ;;  %319 = vpow2.f32 %v306_v10 }
  0xa9   :  { %321 = vrcp.f32 %v128_v13  ;;  %v139_v24 = vand.u32 2147483647, %v128_v13  ;;  %v141_v25 = vand.u32 2147483648, %v128_v13  ;;  %vm135_vm4 = vweird.f32 %v128_v13 }
  0xaa   :  { %323 = vrcp.f32 %v129_v14  ;;  %v154_v27 = vand.u32 2147483647, %v129_v14  ;;  %v156_v29 = vand.u32 2147483648, %v129_v14  ;;  %vm150_vm6 = vweird.f32 %v129_v14 }
  0xab   :  { %vm140_vm5 = vcmp.eq.f32.partialorder %v139_v24, 8.507059e+37  ;;  %v142_v33 = vor.u32 1.1754944e-38, %v141_v25 }
  0xac   :  { %vm155_vm8 = vcmp.eq.f32.partialorder %v154_v27, 8.507059e+37  ;;  %v157_v38 = vor.u32 1.1754944e-38, %v156_v29 }
  0xad   :  { %v318_v15 = vpop.eup %317 }
  0xae   :  { %v320_v16 = vpop.eup %319  ;;  %v239_v17 = vadd.f32 1.0, %v318_v15 }
  0xaf   :  { %v322_v18 = vpop.eup %321  ;;  %v462_v19 = vadd.f32 1.0, %v320_v16 }
  0xb0   :  { %v324_v20 = vpop.eup %323  ;;  %v131_v21 = vmul.f32 %v322_v18, %v128_v13  ;;  %325 = vrcp.f32 %v239_v17  ;;  %vm136_vm2 = vweird.f32 %v322_v18  ;;  %v250_v39 = vand.u32 2147483647, %v239_v17 }
  0xb1   :  { %v146_v22 = vmul.f32 %v324_v20, %v129_v14  ;;  %327 = vrcp.f32 %v462_v19  ;;  %vm151_vm3 = vweird.f32 %v324_v20  ;;  %vm137_vm7 = vmor %vm135_vm4, %vm136_vm2  ;;  %v252_v40 = vand.u32 2147483648, %v239_v17 }
  0xb2   :  { %v132_v23 = vsub.f32 1.0, %v131_v21  ;;  %vm152_vm9 = vmor %vm150_vm6, %vm151_vm3  ;;  %vm246_vm11 = vweird.f32 %v239_v17  ;;  %v267_v52 = vand.u32 2147483648, %v462_v19  ;;  %v265_v55 = vand.u32 2147483647, %v462_v19 }
  0xb3   :  { %v147_v26 = vsub.f32 1.0, %v146_v22  ;;  %vm251_vm14 = vcmp.eq.f32.partialorder %v250_v39, 8.507059e+37  ;;  %vm261_vm15 = vweird.f32 %v462_v19 }
  0xb4   :  { %v133_v28 = vmul.f32 %v322_v18, %v132_v23  ;;  %v268_v56 = vor.u32 1.1754944e-38, %v267_v52  ;;  %vm266_vm1 = vcmp.eq.f32.partialorder %v265_v55, 8.507059e+37 }
  0xb5   :  { %v148_v30 = vmul.f32 %v324_v20, %v147_v26 }
  0xb6   :  { %v326_v31 = vpop.eup %325  ;;  %v134_v32 = vadd.f32 %v322_v18, %v133_v28 }
  0xb7   :  { %v149_v34 = vadd.f32 %v324_v20, %v148_v30  ;;  %v242_v35 = vmul.f32 %v326_v31, %v239_v17  ;;  %v328_v36 = vpop.eup %327  ;;  %vm247_vm10 = vweird.f32 %v326_v31 }
  0xb8   :  { %v138_v37 = vsel %vm137_vm7, %v322_v18, %v134_v32  ;;  %v257_v44 = vmul.f32 %v328_v36, %v462_v19  ;;  %vm262_vm12 = vweird.f32 %v328_v36  ;;  %vm248_vm13 = vmor %vm246_vm11, %vm247_vm10 }
  0xb9   :  { %v143_v41 = vsel %vm140_vm5, %v142_v33, %v138_v37  ;;  %v153_v42 = vsel %vm152_vm9, %v324_v20, %v149_v34  ;;  %v243_v43 = vsub.f32 1.0, %v242_v35  ;;  %vm263_vm0 = vmor %vm261_vm15, %vm262_vm12 }
  0xba   :  { %v158_v45 = vsel %vm155_vm8, %v157_v38, %v153_v42  ;;  %v160_v46 = vmul.f32 %v143_v41, %v432_v5  ;;  %v162_v47 = vmul.f32 %v143_v41, %v422_v1  ;;  %v258_v51 = vsub.f32 1.0, %v257_v44 }
  0xbb   :  { %v161_v48 = vmul.f32 %v158_v45, %v434_v6  ;;  %v163_v49 = vmul.f32 %v158_v45, %v424_v2  ;;  %v244_v50 = vmul.f32 %v326_v31, %v243_v43  ;;  %v253_v1 = vor.u32 1.1754944e-38, %v252_v40 }
  0xbc   :  { %164 = vst [vmem:[#allocation6] sm:$0xff] %v160_v46  ;;  %v259_v54 = vmul.f32 %v328_v36, %v258_v51 }
  0xbd   :  { %165 = vst [vmem:[#allocation6 + $0x8] sm:$0xff] %v161_v48  ;;  %v245_v53 = vadd.f32 %v326_v31, %v244_v50 }
  0xbe   :  { %166 = vst [vmem:[#allocation6 + $0x10] sm:$0xff] %v162_v47  ;;  %v260_v6 = vadd.f32 %v328_v36, %v259_v54 }
  0xbf   :  { %167 = vst [vmem:[#allocation6 + $0x18] sm:$0xff] %v163_v49  ;;  %v249_v5 = vsel %vm248_vm13, %v326_v31, %v245_v53 }
  0xc0   :  { %v254_v2 = vsel %vm251_vm14, %v253_v1, %v249_v5  ;;  %v264_v59 = vsel %vm263_vm0, %v328_v36, %v260_v6 }
  0xc1   :  { %v271_v57 = vmul.f32 %v254_v2, %v438_v7  ;;  %v273_v58 = vmul.f32 %v254_v2, %v426_v3  ;;  %v269_v60 = vsel %vm266_vm1, %v268_v56, %v264_v59 }
  0xc2   :  { %v272_v61 = vmul.f32 %v269_v60, %v440_v8  ;;  %v274_v62 = vmul.f32 %v269_v60, %v430_v4 }
  0xc3   :  { %276 = vst [vmem:[#allocation6 + $0x20] sm:$0xff] %v271_v57 }
  0xc4   :  { %278 = vst [vmem:[#allocation6 + $0x30] sm:$0xff] %v273_v58 }
  0xc5   :  { %277 = vst [vmem:[#allocation6 + $0x28] sm:$0xff] %v272_v61 }
  0xc6   :  { %279 = vst [vmem:[#allocation6 + $0x38] sm:$0xff] %v274_v62 }
  0xc7   :  { %292 = dma.vmem_to_hbm [thread:$0]  %s285_s29, 1024, %s287_s7, [#allocation5], %s382_s23, %s382_s23, %s383_s24  }
  0xc8   :  { %379 = dma.done.wait [#allocation5], 1024  }
  0xc9   :  { %380 = vsyncadd [#allocation5], 4294966272 }
  0xca   :  { %297 = vsyncpa [#allocation4], 1 }
  0xcb   :  { %298 = vsyncpa [#allocation5], 1 }

</bundles_post_ra>
